<compile_context>
chip_gen: v7x
topology: tpu7x:2x2x1
jax: 0.10.0
libtpu: 0.0.40
codegen_flags: <defaults>
</compile_context>

<pallas_src>
import jax
import jax.numpy as jnp
from jax.experimental import pallas as pl
from jax.experimental.pallas import tpu as pltpu


# ---------------------------------------------------------------------------
# pe buffer construction (matches PositionalEncoding2D.__init__ exactly)
# ---------------------------------------------------------------------------
def make_pe(d_model, height, width, dtype=jnp.float32):
    y = jnp.arange(height, dtype=jnp.float32)[:, None, None]        # (H, 1, 1)
    x = jnp.arange(width, dtype=jnp.float32)[None, :, None]         # (1, W, 1)
    div_term = jnp.exp(
        jnp.arange(0, d_model, 2, dtype=jnp.float32)
        * (-jnp.log(jnp.float32(10000.0)) / d_model))                # (d/2,)

    sin_y = jnp.transpose(jnp.sin(y * div_term), (2, 0, 1))          # (d/2, H, 1)
    cos_y = jnp.transpose(jnp.cos(y * div_term), (2, 0, 1))
    sin_x = jnp.transpose(jnp.sin(x * div_term), (2, 0, 1))          # (d/2, 1, W)
    cos_x = jnp.transpose(jnp.cos(x * div_term), (2, 0, 1))

    half = d_model // 2
    pe_even = jnp.broadcast_to(sin_y, (half, height, width)) + sin_x
    pe_odd = jnp.broadcast_to(cos_y, (half, height, width)) + cos_x

    pe = jnp.zeros((d_model, height, width), jnp.float32)
    pe = pe.at[0::2].set(pe_even)
    pe = pe.at[1::2].set(pe_odd)
    return pe.astype(dtype)


# ---------------------------------------------------------------------------
# planning helpers (pure Python, run once per (shape, dtype))
# ---------------------------------------------------------------------------
def _round_up(x, m):
    return -(-x // m) * m


def _min_sublanes(itemsize):
    # Physical sublane packing granularity: f32 -> 8, bf16 -> 16, int8 -> 32.
    return max(8, 32 // itemsize)


def _default_vmem_limit():
    """Chip-aware scoped-VMEM limit with ~25% headroom.

    v5e/v6e: 128 MiB physical -> 96 MiB;  v7x: 64 MiB physical -> 48 MiB.
    """
    try:
        vmem_phys = pltpu.get_tpu_info().vmem_capacity_bytes
    except Exception:
        vmem_phys = 64 << 20          # conservative (v7x has the smallest VMEM)
    return (3 * vmem_phys) // 4


def _choose_lane_block(L, padded_rows, itemsize, budget_bytes):
    """Largest multiple-of-128 lane block whose *padded* tile fits the budget.

    If L < 128 the full extent is used (legal: block dim == array dim).
    The budget already accounts for sublane padding via `padded_rows`.
    """
    if L < 128:
        return L
    max_by_budget = budget_bytes // (padded_rows * itemsize)
    max_by_budget = max(128, (max_by_budget // 128) * 128)
    full_blocks = (L // 128) * 128
    return min(max_by_budget, full_blocks)


def plan_forward(x_shape, x_dtype, vmem_limit_bytes=None):
    """Pick layout, block sizes and grid for x + pe given x's shape/dtype."""
    N, C, H, W = x_shape
    itemsize = jnp.dtype(x_dtype).itemsize
    min_sub = _min_sublanes(itemsize)

    if vmem_limit_bytes is None:
        vmem_limit_bytes = _default_vmem_limit()
    # Working set ~ 2 buffers x (x tile + out tile) + pe tile; keep the padded
    # x tile at <= limit/8 (and <= 8 MiB) so double-buffering never trips the
    # scoped-VMEM limit even on v7x.
    tile_budget = min(8 << 20, vmem_limit_bytes // 8)

    HW = H * W
    if N < min_sub and HW >= 128:
        # Row-dense layout: x -> (N*C, H*W).  Row block is a multiple of C
        # (so a fixed pe "panel", index-independent of the row block, lines
        # up with the channels) grown until it is sublane-dense.
        layout = "row_dense"
        R, L = N * C, HW
        br = C
        while br % min_sub != 0 and br < R:
            br += C
        br = min(br, R)               # br % min_sub == 0 or br == R (both legal)
        pe_rows = br                  # pe panel height (pe tiled br//C times)
    else:
        # Batch-flat layout: x -> (N, C*H*W); pe is a single broadcast row.
        layout = "batch_flat"
        R, L = N, C * HW
        if N < min_sub:
            br = N                    # full extent (legal), sublanes padded
        else:
            br = min((N // min_sub) * min_sub, 4 * min_sub)
        pe_rows = 1

    padded_rows = _round_up(br, min_sub)          # physical sublane footprint
    bl = _choose_lane_block(L, padded_rows, itemsize, tile_budget)
    # Grid: lane blocks OUTER, row blocks INNER.  The pe index map only uses
    # the lane index, so the pe block is unchanged across the inner row sweep
    # and Pallas skips re-fetching it.
    grid = (pl.cdiv(L, bl), pl.cdiv(R, br))
    return dict(layout=layout, R=R, L=L, br=br, bl=bl, pe_rows=pe_rows,
                grid=grid, vmem_limit_bytes=int(vmem_limit_bytes),
                itemsize=itemsize)


def prepare_pe(pe, x_shape, x_dtype, plan):
    """Slice pe to (C, :H, :W), lay it out for `plan`, cast once."""
    d_model, pe_h, pe_w = pe.shape
    N, C, H, W = x_shape
    assert C == d_model, "channel count must equal d_model"
    assert H <= pe_h and W <= pe_w, "x spatial dims exceed precomputed pe dims"
    pe_s = pe[:, :H, :W].astype(x_dtype)
    if plan["layout"] == "row_dense":
        pe2 = pe_s.reshape(C, H * W)
        reps = plan["pe_rows"] // C
        if reps > 1:
            pe2 = jnp.tile(pe2, (reps, 1))        # build the sublane-dense panel
        return pe2                                # (pe_rows, H*W)
    return pe_s.reshape(1, C * H * W)             # (1, C*H*W)


# ---------------------------------------------------------------------------
# kernel + forward
# ---------------------------------------------------------------------------
def _add_pe_kernel(x_ref, pe_ref, o_ref):
    # pe block either matches the x block rows exactly (row_dense layout) or
    # has a single row that broadcasts (batch_flat layout).
    o_ref[...] = (x_ref[...] + pe_ref[...]).astype(o_ref.dtype)


def positional_encoding_2d(x, pe_prep, plan):
    """forward(x) = x + pe (pe_prep / plan built once via prepare_pe/plan_forward)."""
    N, C, H, W = x.shape
    R, L, br, bl = plan["R"], plan["L"], plan["br"], plan["bl"]
    pe_rows = plan["pe_rows"]
    n_lane_blocks, n_row_blocks = plan["grid"]

    x2 = x.reshape(R, L)                           # free: contiguous reshape

    out2 = pl.pallas_call(
        _add_pe_kernel,
        out_shape=jax.ShapeDtypeStruct((R, L), x.dtype),
        grid_spec=pl.GridSpec(
            grid=(n_lane_blocks, n_row_blocks),    # (lanes outer, rows inner)
            in_specs=[
                pl.BlockSpec((br, bl), lambda j, i: (i, j)),
                pl.BlockSpec((pe_rows, bl), lambda j, i: (0, j)),  # row-indep.
            ],
            out_specs=pl.BlockSpec((br, bl), lambda j, i: (i, j)),
        ),
        compiler_params=pltpu.CompilerParams(
            dimension_semantics=("parallel", "parallel"),
            vmem_limit_bytes=plan["vmem_limit_bytes"],
        ),
        cost_estimate=pl.CostEstimate(
            flops=R * L,
            transcendentals=0,
            bytes_accessed=(2 * R * L + int(pe_prep.size)) * plan["itemsize"],
        ),
    )(x2, pe_prep)
    return out2.reshape(N, C, H, W)


# ---------------------------------------------------------------------------
# tests
# ---------------------------------------------------------------------------
if __name__ == "__main__":
    d_model, height, width = 4, 16, 16
    N = 2
    pe = make_pe(d_model, height, width)

    # --- test 1: row-dense layout, single dense (8, 256) tile -----------------
    x = jax.random.normal(jax.random.PRNGKey(0),
                          (N, d_model, height, width), dtype=jnp.float32)
    plan = plan_forward(x.shape, x.dtype)
    pe_prep = prepare_pe(pe, x.shape, x.dtype, plan)
    out = jax.block_until_ready(positional_encoding_2d(x, pe_prep, plan))
    ref = x + pe[:, :height, :width]
    assert out.shape == x.shape
    assert jnp.allclose(out, ref, atol=1e-6, rtol=1e-6)

    # --- test 2: x smaller than pe, L=225 -> cdiv grid with ragged lane block -
    h2, w2 = 15, 15
    x2 = jax.random.normal(jax.random.PRNGKey(1),
                           (N, d_model, h2, w2), dtype=jnp.float32)
    plan2 = plan_forward(x2.shape, x2.dtype)
    pe_prep2 = prepare_pe(pe, x2.shape, x2.dtype, plan2)
    out2 = jax.block_until_ready(positional_encoding_2d(x2, pe_prep2, plan2))
    ref2 = x2 + pe[:, :h2, :w2]
    assert out2.shape == x2.shape
    assert jnp.allclose(out2, ref2, atol=1e-6, rtol=1e-6)

    # --- test 3: H*W < 128 -> batch-flat layout with broadcast pe row ---------
    h3, w3 = 8, 8
    x3 = jax.random.normal(jax.random.PRNGKey(2),
                           (N, d_model, h3, w3), dtype=jnp.float32)
    plan3 = plan_forward(x3.shape, x3.dtype)
    pe_prep3 = prepare_pe(pe, x3.shape, x3.dtype, plan3)
    out3 = jax.block_until_ready(positional_encoding_2d(x3, pe_prep3, plan3))
    ref3 = x3 + pe[:, :h3, :w3]
    assert out3.shape == x3.shape
    assert jnp.allclose(out3, ref3, atol=1e-6, rtol=1e-6)

    print("KERNEL_OK")
</pallas_src>

<mosaic_0001>
module attributes {stable_mosaic.version = 11 : i64} {
  func.func @_add_pe_kernel(%arg0: i32, %arg1: i32, %arg2: memref<8x256xf32, #tpu.memory_space<vmem>>, %arg3: memref<8x256xf32, #tpu.memory_space<vmem>>, %arg4: memref<8x256xf32, #tpu.memory_space<vmem>>) attributes {dimension_semantics = [#tpu.dimension_semantics<parallel>, #tpu.dimension_semantics<parallel>], iteration_bounds = array<i64: 1, 1>, scalar_prefetch = 0 : i64, scratch_operands = 0 : i64, tpu.core_type = #tpu.core_type<tc>, window_params = [{transform_indices = @transform_0, window_bounds = array<i64: 8, 256>}, {transform_indices = @transform_1, window_bounds = array<i64: 8, 256>}, {transform_indices = @transform_2, window_bounds = array<i64: 8, 256>}]} {
    %c0 = arith.constant 0 : index
    %c0_0 = arith.constant 0 : index
    %0 = vector.load %arg2[%c0, %c0_0] : memref<8x256xf32, #tpu.memory_space<vmem>>, vector<8x256xf32>
    %c0_1 = arith.constant 0 : index
    %c0_2 = arith.constant 0 : index
    %1 = vector.load %arg3[%c0_1, %c0_2] : memref<8x256xf32, #tpu.memory_space<vmem>>, vector<8x256xf32>
    %2 = arith.addf %0, %1 : vector<8x256xf32>
    %c0_3 = arith.constant 0 : index
    %c0_4 = arith.constant 0 : index
    %3 = vector.load %arg4[%c0_3, %c0_4] : memref<8x256xf32, #tpu.memory_space<vmem>>, vector<8x256xf32>
    tpu.vector_store %arg4[%c0_3, %c0_4], %2 {strides = array<i32>} : memref<8x256xf32, #tpu.memory_space<vmem>>, vector<8x256xf32>,
    return
  }
  func.func @transform_0(%arg0: i32, %arg1: i32) -> (i32, i32) {
    %c0_i32 = arith.constant 0 : i32
    return %arg1, %arg0 : i32, i32
  }
  func.func @transform_1(%arg0: i32, %arg1: i32) -> (i32, i32) {
    %c0_i32 = arith.constant 0 : i32
    %c0_i32_0 = arith.constant 0 : i32
    return %c0_i32, %arg0 : i32, i32
  }
  func.func @transform_2(%arg0: i32, %arg1: i32) -> (i32, i32) {
    %c0_i32 = arith.constant 0 : i32
    return %arg1, %arg0 : i32, i32
  }
}

</mosaic_0001>

<bundles_post_ra>
// kernel: tpu_custom_call.1
= control target key start
LH: loop header
LB: loop body
LE: loop exit
PB: predicated region body
PF: predicated region fallthrough
CT: control target
= control target key end

     0   :  { %7 = vsyncpa [#allocation3], 0  ;;  %s189_s0 = inlined_call_operand.hbm [shape: f32[8,256], index: 0, kind: input, shape index: {}]   ;;  %s190_s1 = inlined_call_operand.hbm [shape: f32[8,256], index: 1, kind: input, shape index: {}]   ;;  %s191_s2 = inlined_call_operand.hbm [shape: f32[8,256], index: 2, kind: output, shape index: {}]  }
   0x1   :  { %8 = vsyncpa [#allocation6], 0 }
   0x2   :  { %9 = vsyncpa [#allocation4], 0  ;;  %s135_s9 = smov [#allocation2]   ;;  %s136_s11 = smov [#allocation5]  }
   0x3   :  { %s16_s10 = sshll.u32 %s135_s9, 4  ;;  %s26_s12 = sshll.u32 %s136_s11, 4  ;;  %s17_s10 = int_to_ptr.vmem [resolvable:$true] %s16_s10  ;;  %s27_s12 = int_to_ptr.vmem [resolvable:$true] %s26_s12 }
   0x4   :  { %s63_s15 = scalar_lea.hbm %s189_s0, 256 }
   0x5   :  { %p64_p0 = scmp.ne.s32.totalorder %s189_s0, %s63_s15  ;;  %p67_p1 = scmp.lt.u32.totalorder %s63_s15, %s189_s0 }
   0x7   :  { %p69_p2 = pnand %p67_p1, %p64_p0 }
   0x9   :  { %72 = shalt.err (!%p69_p2)
}
   0xa   :  { %s73_s20 = scalar_lea.vmem %s17_s10, 256  ;;  %p78_p4 = scmp.lt.s32.totalorder %s17_s10, %s17_s10 }
   0xb   :  { %p74_p3 = scmp.ne.s32.totalorder %s17_s10, %s73_s20  ;;  %p79_p5 = scmp.lt.s32.totalorder %s73_s20, %s73_s20 }
   0xd   :  { %p80_p6 = por %p79_p5, %p78_p4 }
   0xf   :  { %p81_p7 = pnand %p80_p6, %p74_p3 }
  0x11   :  { %84 = shalt.err (!%p81_p7)
}
  0x12   :  { %19 = dma.hbm_to_vmem [thread:$0]  %s189_s0, 256, %s17_s10, [#allocation3]  }
  0x13   :  { %s85_s25 = scalar_lea.hbm %s190_s1, 256 }
  0x14   :  { %p86_p8 = scmp.ne.s32.totalorder %s190_s1, %s85_s25  ;;  %p89_p9 = scmp.lt.u32.totalorder %s85_s25, %s190_s1 }
  0x16   :  { %p91_p10 = pnand %p89_p9, %p86_p8 }
  0x18   :  { %94 = shalt.err (!%p91_p10)
}
  0x19   :  { %s95_s30 = scalar_lea.vmem %s27_s12, 256  ;;  %p100_p12 = scmp.lt.s32.totalorder %s27_s12, %s27_s12 }
  0x1a   :  { %p96_p11 = scmp.ne.s32.totalorder %s27_s12, %s95_s30  ;;  %p101_p13 = scmp.lt.s32.totalorder %s95_s30, %s95_s30 }
  0x1c   :  { %p102_p0 = por %p101_p13, %p100_p12 }
  0x1e   :  { %p103_p1 = pnand %p102_p0, %p96_p11 }
  0x20   :  { %106 = shalt.err (!%p103_p1)
}
  0x21   :  { %29 = dma.hbm_to_vmem [thread:$0]  %s190_s1, 256, %s27_s12, [#allocation6]  }
  0x22   :  { %129 = dma.done.wait [#allocation3], 256  }
  0x23   :  { %130 = vsyncadd [#allocation3], 4294967040 }
  0x24   :  { %131 = dma.done.wait [#allocation6], 256  }
  0x25   :  { %132 = vsyncadd [#allocation6], 4294967040  ;;  %s137_s4 = smov [#allocation7]   ;;  %v36_v0 = vld [vmem:[#allocation2] sm:$0xff]  ;;  %v38_v1 = vld [vmem:[#allocation5] sm:$0xff] }
  0x26   :  { %s50_s5 = sshll.u32 %s137_s4, 4  ;;  %v37_v2 = vld [vmem:[#allocation2 + $0x8] sm:$0xff]  ;;  %v40_v3 = vadd.f32 %v38_v1, %v36_v0  ;;  %v39_v4 = vld [vmem:[#allocation5 + $0x8] sm:$0xff]  ;;  %s51_s5 = int_to_ptr.vmem [resolvable:$true] %s50_s5 }
  0x27   :  { %v41_v5 = vadd.f32 %v39_v4, %v37_v2  ;;  %s107_s6 = scalar_lea.vmem %s51_s5, 256  ;;  %p112_p3 = scmp.lt.s32.totalorder %s51_s5, %s51_s5 }
  0x28   :  { %42 = vst [vmem:[#allocation7] sm:$0xff] %v40_v3  ;;  %p108_p2 = scmp.ne.s32.totalorder %s51_s5, %s107_s6  ;;  %p113_p4 = scmp.lt.s32.totalorder %s107_s6, %s107_s6 }
  0x29   :  { %43 = vst [vmem:[#allocation7 + $0x8] sm:$0xff] %v41_v5 }
  0x2a   :  { %p114_p5 = por %p113_p4, %p112_p3 }
  0x2c   :  { %p115_p6 = pnand %p114_p5, %p108_p2 }
  0x2e   :  { %118 = shalt.err (!%p115_p6)
}
  0x2f   :  { %s119_s8 = scalar_lea.hbm %s191_s2, 256 }
  0x30   :  { %p120_p7 = scmp.ne.s32.totalorder %s191_s2, %s119_s8  ;;  %p123_p8 = scmp.lt.u32.totalorder %s119_s8, %s191_s2 }
  0x32   :  { %p125_p9 = pnand %p123_p8, %p120_p7 }
  0x34   :  { %128 = shalt.err (!%p125_p9)
}
  0x35   :  { %53 = dma.vmem_to_hbm [thread:$0]  %s51_s5, 256, %s191_s2, [#allocation4]  }
  0x36   :  { %133 = dma.done.wait [#allocation4], 256  }
  0x37   :  { %134 = vsyncadd [#allocation4], 4294967040 }
  0x38   :  { %57 = vsyncpa [#allocation3], 1 }
  0x39   :  { %58 = vsyncpa [#allocation6], 1 }
  0x3a   :  { %59 = vsyncpa [#allocation4], 1 }

</bundles_post_ra>
